<compile_context>
chip_gen: v7x
topology: tpu7x:2x2x1
jax: 0.10.0
libtpu: 0.0.40
codegen_flags: <defaults>
</compile_context>

<pallas_src>
import functools

import jax
import jax.numpy as jnp
from jax import lax
from jax.experimental import pallas as pl
from jax.experimental.pallas import tpu as pltpu


def _space_to_depth_kernel(x_ref, s_ref, o_ref, *, bs, w, ow):
    """One grid step: a tile of (c, oh) rows for one batch element.

    x_ref : (tr, bs*w)        row layout along lanes is (bh, w) -- contiguous
    s_ref : (w, bs*ow)        one-hot lane-deinterleave matrix (constant)
    o_ref : (bs*bs, tr, ow)   output phases p = bh*bs + bw
    """
    x = x_ref[...]
    s = s_ref[...]
    for bh in range(bs):
        # Static, unit-stride lane slice (no strided / masked vreg reads).
        chunk = x[:, bh * w:(bh + 1) * w]                       # (tr, w)
        # One-hot permutation matmul: z[:, bw*ow + o] == chunk[:, o*bs + bw].
        z = jnp.dot(
            chunk, s,
            preferred_element_type=jnp.float32,
            precision=lax.Precision.HIGHEST,
        )                                                       # (tr, bs*ow)
        z = z.astype(o_ref.dtype)
        for bw in range(bs):
            o_ref[bh * bs + bw, :, :] = z[:, bw * ow:(bw + 1) * ow]


def _pick_row_tile(r, row_bytes, target_bytes):
    """Largest row tile (divisor of r) under the byte budget, keeping the
    (8,128) block rule: tile == r or tile % 8 == 0."""
    max_rows = max(1, target_bytes // max(1, row_bytes))
    if r <= max_rows:
        return r
    best = None
    for cand in range(1, r + 1):
        if r % cand == 0 and cand <= max_rows and cand % 8 == 0:
            best = cand
    if best is None:
        best = max(d for d in range(1, r + 1) if r % d == 0 and d <= max_rows)
    return best


def space_to_depth(x, block_size, *, target_block_bytes=1 << 20):
    n, c, h, w = x.shape
    bs = block_size
    assert h % bs == 0 and w % bs == 0, "H and W must be divisible by block_size"
    if not jnp.issubdtype(x.dtype, jnp.floating):
        raise NotImplementedError("float dtypes only (see TODO at top of file)")

    oh, ow = h // bs, w // bs
    r = c * oh

    # Free row-major reshape: rows = (c, oh), columns = (bh, w) contiguous.
    x2 = x.reshape(n, r, bs * w)

    # One-hot de-interleave matrix: column q = bw*OW + ow picks lane ow*bs + bw.
    q = jnp.arange(bs * ow, dtype=jnp.int32)
    src = (q % ow) * bs + (q // ow)
    s = (jnp.arange(w, dtype=jnp.int32)[:, None] == src[None, :]).astype(x.dtype)

    tr = _pick_row_tile(r, bs * w * x.dtype.itemsize, target_block_bytes)

    kernel = functools.partial(_space_to_depth_kernel, bs=bs, w=w, ow=ow)

    ys = pl.pallas_call(
        kernel,
        out_shape=jax.ShapeDtypeStruct((n, bs * bs, r, ow), x.dtype),
        grid=(n, r // tr),
        in_specs=[
            pl.BlockSpec((None, tr, bs * w), lambda i, j: (i, j, 0)),
            pl.BlockSpec((w, bs * ow), lambda i, j: (0, 0)),  # resident constant
        ],
        out_specs=pl.BlockSpec((None, bs * bs, tr, ow), lambda i, j: (i, 0, j, 0)),
        compiler_params=pltpu.CompilerParams(
            dimension_semantics=("parallel", "parallel"),
        ),
    )(x2, s)

    # Free row-major reshape back to the module's output layout.
    return ys.reshape(n, bs * bs * c, oh, ow)


def _space_to_depth_ref(x, bs):
    # Pure-JAX reference mirroring the PyTorch forward exactly.
    n, c, h, w = x.shape
    y = x.reshape(n, c, h // bs, bs, w // bs, bs)
    y = jnp.transpose(y, (0, 3, 5, 1, 2, 4))
    return y.reshape(n, c * bs * bs, h // bs, w // bs)


if __name__ == "__main__":
    block_size = 2
    key = jax.random.PRNGKey(0)
    x = jax.random.normal(key, (2, 4, 16, 16), dtype=jnp.float32)

    out = jax.block_until_ready(space_to_depth(x, block_size))
    expected = _space_to_depth_ref(x, block_size)

    assert out.shape == expected.shape, (out.shape, expected.shape)
    assert out.dtype == expected.dtype, (out.dtype, expected.dtype)
    # The one-hot selection matmul is exact in practice (x*1 plus zeros at
    # HIGHEST precision); keep a tiny tolerance for MXU accumulation quirks.
    err = float(jnp.max(jnp.abs(out - expected)))
    assert jnp.allclose(out, expected, atol=1e-5, rtol=1e-5), err

    print("KERNEL_OK")
</pallas_src>

<mosaic_0001>
module attributes {stable_mosaic.version = 11 : i64} {
  func.func @_space_to_depth_kernel(%arg0: i32, %arg1: i32, %arg2: memref<1x32x32xf32, #tpu.memory_space<vmem>>, %arg3: memref<16x16xf32, #tpu.memory_space<vmem>>, %arg4: memref<1x4x32x8xf32, #tpu.memory_space<vmem>>) attributes {dimension_semantics = [#tpu.dimension_semantics<parallel>, #tpu.dimension_semantics<parallel>], iteration_bounds = array<i64: 2, 1>, scalar_prefetch = 0 : i64, scratch_operands = 0 : i64, tpu.core_type = #tpu.core_type<tc>, window_params = [{transform_indices = @transform_0, window_bounds = array<i64: 1, 32, 32>}, {pipeline_mode = #tpu.pipeline_mode<synchronous>, transform_indices = @transform_1, window_bounds = array<i64: 16, 16>}, {transform_indices = @transform_2, window_bounds = array<i64: 1, 4, 32, 8>}]} {
    %c0 = arith.constant 0 : index
    %c0_0 = arith.constant 0 : index
    %c0_1 = arith.constant 0 : index
    %0 = vector.load %arg2[%c0, %c0_0, %c0_1] : memref<1x32x32xf32, #tpu.memory_space<vmem>>, vector<1x32x32xf32>
    %1 = vector.shape_cast %0 : vector<1x32x32xf32> to vector<32x32xf32>
    %c0_2 = arith.constant 0 : index
    %c0_3 = arith.constant 0 : index
    %2 = vector.load %arg3[%c0_2, %c0_3] : memref<16x16xf32, #tpu.memory_space<vmem>>, vector<16x16xf32>
    %3 = vector.extract_strided_slice %1 {offsets = [0, 0], sizes = [32, 16], strides = [1, 1]} : vector<32x32xf32> to vector<32x16xf32>
    %cst = arith.constant dense<0.000000e+00> : vector<32x16xf32>
    %4 = tpu.matmul %3, %2, %cst {dimension_numbers = #tpu.dot_dimension_numbers<[1], [0], [0], [1], [0, 0, 1, 1], [], []>, precision = #tpu.contract_precision<fp32>} : vector<32x16xf32>, vector<16x16xf32>, vector<32x16xf32> -> vector<32x16xf32>
    %5 = vector.extract_strided_slice %4 {offsets = [0, 0], sizes = [32, 8], strides = [1, 1]} : vector<32x16xf32> to vector<32x8xf32>
    %c0_4 = arith.constant 0 : index
    %c0_5 = arith.constant 0 : index
    %c0_6 = arith.constant 0 : index
    %c0_7 = arith.constant 0 : index
    %6 = vector.load %arg4[%c0_4, %c0_5, %c0_6, %c0_7] : memref<1x4x32x8xf32, #tpu.memory_space<vmem>>, vector<1x1x32x8xf32>
    %7 = vector.shape_cast %6 : vector<1x1x32x8xf32> to vector<32x8xf32>
    %8 = vector.shape_cast %5 : vector<32x8xf32> to vector<1x1x32x8xf32>
    tpu.vector_store %arg4[%c0_4, %c0_5, %c0_6, %c0_7], %8 {strides = array<i32>} : memref<1x4x32x8xf32, #tpu.memory_space<vmem>>, vector<1x1x32x8xf32>,
    %9 = vector.extract_strided_slice %4 {offsets = [0, 8], sizes = [32, 8], strides = [1, 1]} : vector<32x16xf32> to vector<32x8xf32>
    %c0_8 = arith.constant 0 : index
    %c1 = arith.constant 1 : index
    %c0_9 = arith.constant 0 : index
    %c0_10 = arith.constant 0 : index
    %10 = vector.load %arg4[%c0_8, %c1, %c0_9, %c0_10] : memref<1x4x32x8xf32, #tpu.memory_space<vmem>>, vector<1x1x32x8xf32>
    %11 = vector.shape_cast %10 : vector<1x1x32x8xf32> to vector<32x8xf32>
    %12 = vector.shape_cast %9 : vector<32x8xf32> to vector<1x1x32x8xf32>
    tpu.vector_store %arg4[%c0_8, %c1, %c0_9, %c0_10], %12 {strides = array<i32>} : memref<1x4x32x8xf32, #tpu.memory_space<vmem>>, vector<1x1x32x8xf32>,
    %13 = vector.extract_strided_slice %1 {offsets = [0, 16], sizes = [32, 16], strides = [1, 1]} : vector<32x32xf32> to vector<32x16xf32>
    %cst_11 = arith.constant dense<0.000000e+00> : vector<32x16xf32>
    %14 = tpu.matmul %13, %2, %cst_11 {dimension_numbers = #tpu.dot_dimension_numbers<[1], [0], [0], [1], [0, 0, 1, 1], [], []>, precision = #tpu.contract_precision<fp32>} : vector<32x16xf32>, vector<16x16xf32>, vector<32x16xf32> -> vector<32x16xf32>
    %15 = vector.extract_strided_slice %14 {offsets = [0, 0], sizes = [32, 8], strides = [1, 1]} : vector<32x16xf32> to vector<32x8xf32>
    %c0_12 = arith.constant 0 : index
    %c2 = arith.constant 2 : index
    %c0_13 = arith.constant 0 : index
    %c0_14 = arith.constant 0 : index
    %16 = vector.load %arg4[%c0_12, %c2, %c0_13, %c0_14] : memref<1x4x32x8xf32, #tpu.memory_space<vmem>>, vector<1x1x32x8xf32>
    %17 = vector.shape_cast %16 : vector<1x1x32x8xf32> to vector<32x8xf32>
    %18 = vector.shape_cast %15 : vector<32x8xf32> to vector<1x1x32x8xf32>
    tpu.vector_store %arg4[%c0_12, %c2, %c0_13, %c0_14], %18 {strides = array<i32>} : memref<1x4x32x8xf32, #tpu.memory_space<vmem>>, vector<1x1x32x8xf32>,
    %19 = vector.extract_strided_slice %14 {offsets = [0, 8], sizes = [32, 8], strides = [1, 1]} : vector<32x16xf32> to vector<32x8xf32>
    %c0_15 = arith.constant 0 : index
    %c3 = arith.constant 3 : index
    %c0_16 = arith.constant 0 : index
    %c0_17 = arith.constant 0 : index
    %20 = vector.load %arg4[%c0_15, %c3, %c0_16, %c0_17] : memref<1x4x32x8xf32, #tpu.memory_space<vmem>>, vector<1x1x32x8xf32>
    %21 = vector.shape_cast %20 : vector<1x1x32x8xf32> to vector<32x8xf32>
    %22 = vector.shape_cast %19 : vector<32x8xf32> to vector<1x1x32x8xf32>
    tpu.vector_store %arg4[%c0_15, %c3, %c0_16, %c0_17], %22 {strides = array<i32>} : memref<1x4x32x8xf32, #tpu.memory_space<vmem>>, vector<1x1x32x8xf32>,
    return
  }
  func.func @transform_0(%arg0: i32, %arg1: i32) -> (i32, i32, i32) {
    %c0_i32 = arith.constant 0 : i32
    %c0_i32_0 = arith.constant 0 : i32
    return %arg0, %arg1, %c0_i32 : i32, i32, i32
  }
  func.func @transform_1(%arg0: i32, %arg1: i32) -> (i32, i32) {
    %c0_i32 = arith.constant 0 : i32
    %c0_i32_0 = arith.constant 0 : i32
    %c0_i32_1 = arith.constant 0 : i32
    return %c0_i32, %c0_i32_0 : i32, i32
  }
  func.func @transform_2(%arg0: i32, %arg1: i32) -> (i32, i32, i32, i32) {
    %c0_i32 = arith.constant 0 : i32
    %c0_i32_0 = arith.constant 0 : i32
    %c0_i32_1 = arith.constant 0 : i32
    return %arg0, %c0_i32, %arg1, %c0_i32_0 : i32, i32, i32, i32
  }
}

</mosaic_0001>

<bundles_post_ra>
// kernel: tpu_custom_call.1
= control target key start
LH: loop header
LB: loop body
LE: loop exit
PB: predicated region body
PF: predicated region fallthrough
CT: control target
= control target key end

     0   :  { %7 = vsyncpa [#allocation3], 0  ;;  %s2351_s0 = inlined_call_operand.hbm [shape: f32[2,32,32], index: 0, kind: input, shape index: {}]   ;;  %s2352_s1 = inlined_call_operand.hbm [shape: f32[16,16], index: 1, kind: input, shape index: {}]   ;;  %s2353_s2 = inlined_call_operand.vmem [shape: f32[2,4,32,8], index: 2, kind: output, shape index: {}]  }
   0x1   :  { %9 = vsyncpa [#allocation3 + $0x1], 0 }
   0x2   :  { %10 = vsyncpa [#allocation5], 0  ;;  %s2089_s9 = smov 0   ;;  %s2091_s10 = smov 0  }
   0x3   :  { %s2093_s11 = smov 0   ;;  %s2095_s12 = smov 0  }
   0x4   :  { %s2097_s13 = smov 0   ;;  %s2099_s14 = smov 0  }
   0x5 LB: > { %s1575_s15 = sadd.s32 4294967295, %s2066_s14   ;;  %p50_p0 = scmp.ne.s32.totalorder %s2050_s10, %s2046_s9  ;;  %s2066_s14 = sphi %s2099_s14, %s16_s14   ;;  %s2062_s13 = sphi %s2097_s13, %s2370_s13   ;;  %s2058_s12 = sphi %s2095_s12, %s2369_s12   ;;  %s2054_s11 = sphi %s2093_s11, %s2368_s11   ;;  %s2050_s10 = sphi %s2091_s10, %s2367_s10   ;;  %s2046_s9 = sphi %s2089_s9, %s2366_s9  }
   0x6   : > { %p2119_p1 = scmp.eq.s32.totalorder %s1575_s15, 0  ;;  %p1577_p2 = scmp.ge.s32.totalorder %s2066_s14, 1 }
   0x7   : > { %p110_p3 = scmp.lt.s32.totalorder %s2066_s14, 3  ;;  %s2068_s19 = smov [#allocation4]  }
   0x8   : > { %s2358_s16 = scalar_select %p2119_p1, 1, 0 }
   0x9   : > { %p2127_p4 = por %p2119_p1, %p50_p0  ;;  %p2131_p5 = pnand %p1577_p2, %p110_p3 }
   0xa   : > { %s122_s20 = sshll.u32 %s2068_s19, 4  ;;  %s28_s22 = sadd.s32 1, %s2062_s13  ;;  %s123_s20 = int_to_ptr.vmem [resolvable:$true] %s122_s20 }
   0xb   : > { %s2359_s17 = scalar_select %p2127_p4, 1, 0 }
   0xc   : > { %s2360_s18 = scalar_select %p2131_p5, 1, 0 }
   0xd   : > { %p1890_p6 = pneg %p2131_p5  ;;  %s1954_s25 = scalar_lea.hbm %s2352_s1, 256 }
   0xe   : > { %p1955_p8 = scmp.ne.s32.totalorder %s2352_s1, %s1954_s25  ;;  %p1961_p12 = scmp.lt.u32.totalorder %s1954_s25, %s2352_s1 }
   0xf   : > { %p2139_p7 = pnand %p1890_p6, %p2119_p1 }
  0x11   : > { %p1956_p9 = pneg %p2139_p7 }
  0x13   : > { %p1957_p10 = pnand %p1956_p9, %p1955_p8 }
  0x15   : > { %p1958_p11 = pneg %p1957_p10 }
  0x17   : > { %p1963_p13 = pnand %p1961_p12, %p1958_p11 }
  0x19   : > { %1966 = shalt.err (!%p1963_p13)
}
  0x1a   : > { %s1967_s30 = scalar_lea.vmem %s123_s20, 256  ;;  %p1975_p6 = scmp.lt.s32.totalorder %s123_s20, %s123_s20 }
  0x1b   : > { %p1968_p0 = scmp.ne.s32.totalorder %s123_s20, %s1967_s30  ;;  %p1976_p1 = scmp.lt.s32.totalorder %s1967_s30, %s1967_s30 }
  0x1d   : > { %p1970_p2 = pnand %p1968_p0, %p1956_p9  ;;  %p1977_p4 = por %p1976_p1, %p1975_p6 }
  0x1f   : > { %p1971_p3 = pneg %p1970_p2 }
  0x21   : > { %p1978_p5 = pnand %p1977_p4, %p1971_p3 }
  0x23   : > { %1981 = shalt.err (!%p1978_p5)
}
  0x24   : > { %s2069_s3 = smov 128   ;;  %s2070_s4 = smov 8  }
  0x25   : > { %1893 = dma.hbm_to_vmem [thread:$0]  (!%p2139_p7), %s2352_s1, 256, %s123_s20, [#allocation5], %s2069_s3, %s2069_s3, %s2070_s4  }
  0x26   : > { %p30_p1 = scmp.ge.s32.totalorder %s28_s22, 2  ;;  %s37_s7 = sadd.s32 1, %s2054_s11 }
  0x27   : > { %p44_p4 = scmp.ne.s32.totalorder %s2054_s11, %s2050_s10  ;;  %p45_p5 = scmp.eq.s32.totalorder %s2066_s14, 0 }
  0x28   : > { %s2372_s22 = smov (%p30_p1, %s28_s22), 0  ;;  %p1899_p9 = scmp.lt.s32.totalorder %s2066_s14, 2 }
  0x29   : > { %p46_p8 = por %p45_p5, %p44_p4  ;;  %s32_s8 = ssub.s32 %s2062_s13, %s2372_s22 }
  0x2a   : > { %s136_s9 = sand.u32 1, %s2054_s11   ;;  %p35_p10 = scmp.eq.s32.totalorder %s32_s8, 0 }
  0x2b   : > { %s1580_s15 = sshll.u32 %s136_s9, 5  ;;  %s1602_s19 = sshll.u32 %s2062_s13, 9 }
  0x2c   : > { %s2175_s21 = scalar_select %p35_p10, %s2054_s11, %s37_s7  }
  0x2d   : > { %s2180_s20 = scalar_lea.hbm %s2351_s0, %s1602_s19  ;;  %s140_s25 = scalar_lea.vmem [#allocation2], %s1580_s15 }
  0x2e   : > { %s149_s26 = sshll.u32 %s140_s25, 4  ;;  %p2182_p7 = pnand %p1899_p9, %p46_p8  ;;  %s2186_s26 = int_to_ptr.vmem [resolvable:$true] %s149_s26 }
  0x2f   : > { %s2188_s28 = scalar_lea.sflag [#allocation3], %s136_s9  ;;  %s1982_s29 = scalar_lea.hbm %s2180_s20, 512 }
  0x30   : > { %p1983_p11 = scmp.ne.s32.totalorder %s2180_s20, %s1982_s29  ;;  %p1984_p12 = pneg %p2182_p7 }
  0x31   : > { %s1987_s6 = scalar_lea.hbm %s2351_s0, 1024  ;;  %p1988_p2 = scmp.lt.u32.totalorder %s2180_s20, %s2351_s0 }
  0x32   : > { %p1985_p13 = pnand %p1984_p12, %p1983_p11  ;;  %p1989_p3 = scmp.lt.u32.totalorder %s1987_s6, %s1982_s29 }
  0x33   : > { %p1991_p1 = scmp.lt.u32.totalorder %s1982_s29, %s2180_s20 }
  0x34   : > { %p1986_p0 = pneg %p1985_p13  ;;  %p1990_p6 = por %p1989_p3, %p1988_p2 }
  0x36   : > { %p1992_p4 = por %p1991_p1, %p1990_p6 }
  0x38   : > { %p1993_p5 = pnand %p1992_p4, %p1986_p0 }
  0x3a   : > { %1996 = shalt.err (!%p1993_p5)
}
  0x3b   : > { %s1997_s9 = scalar_lea.vmem %s2186_s26, 512  ;;  %s2071_s15 = smov [#allocation2]  }
  0x3c   : > { %p1998_p8 = scmp.ne.s32.totalorder %s2186_s26, %s1997_s9  ;;  %s2002_s19 = sshll.u32 %s2071_s15, 4  ;;  %s2003_s19 = int_to_ptr.vmem [resolvable:$false] %s2002_s19 }
  0x3d   : > { %s2004_s23 = scalar_lea.vmem %s2003_s19, 1024  ;;  %p2005_p11 = scmp.lt.s32.totalorder %s2186_s26, %s2003_s19 }
  0x3e   : > { %p2000_p9 = pnand %p1998_p8, %p1984_p12  ;;  %p2006_p13 = scmp.lt.s32.totalorder %s2004_s23, %s1997_s9 }
  0x40   : > { %p2001_p10 = pneg %p2000_p9  ;;  %p2007_p2 = por %p2006_p13, %p2005_p11 }
  0x42   : > { %p2008_p3 = pnand %p2007_p2, %p2001_p10 }
  0x44   : > { %2011 = shalt.err (!%p2008_p3)
}
  0x45   : > { %1897 = dma.hbm_to_vmem [thread:$0]  (!%p2182_p7), %s2180_s20, 512, %s2186_s26, %s2188_s28, %s2069_s3, %s2069_s3, %s2070_s4  }
  0x46   : > { %p2363_p12 = scmp.ne.s32.totalorder %s2360_s18, 0 }
  0x47   : > { %s163_s24 = sand.u32 (!%p2363_p12), 1, %s2050_s10   ;;  %p2364_p0 = scmp.ne.s32.totalorder (!%p2363_p12), %s2359_s17, 0 }
  0x48   : > { %161 = sbr.rel (%p2363_p12) target bundleno = 587 (0x24b), region = 28  ;;  %s1584_s25 = sshll.u32 (!%p2363_p12), %s163_s24, 5 }
  0x49   : > { %s164_s29 = scalar_lea.sflag (!%p2363_p12), [#allocation3], %s163_s24  ;;  %s167_s30 = scalar_lea.vmem (!%p2363_p12), [#allocation2], %s1584_s25 }
  0x4f   : > { %2037 = dma.done.wait (%p2364_p0), %s164_s29, 512  }
  0x50   : > { %2039 = vsyncadd (%p2364_p0), %s164_s29, 4294966784  ;;  %p2365_p6 = scmp.ne.s32.totalorder %s2358_s16, 0 }
  0x52   : > { %2041 = dma.done.wait (%p2365_p6), [#allocation5], 256  }
  0x53   : > { %2043 = vsyncadd (%p2365_p6), [#allocation5], 4294967040  ;;  %vm213_vm0 = vcmask 130048   ;;  %v209_v0 = vld [vmem:[%s167_s30 + $0x10] sm:$0xff]  ;;  %v207_v1 = vld [vmem:[%s167_s30] sm:$0xff]  ;;  %s2072_s18 = smov 112  }
  0x54   : > { %v210_v2 = vld [vmem:[%s167_s30 + $0x18] sm:$0xff]  ;;  %844 = vrot.lane.b32.xlu1 %v209_v0, %s2072_s18  ;;  %v221_v3 = vsel %vm213_vm0, %v209_v0, 0  ;;  %840 = vrot.lane.b32.xlu0 %v207_v1, %s2072_s18  ;;  %v215_v4 = vsel %vm213_vm0, %v207_v1, 0  ;;  %v208_v6 = vld [vmem:[%s167_s30 + $0x8] sm:$0xff]  ;;  %v211_v7 = vld [vmem:[#allocation4] sm:$0xff]  ;;  %p198_p7 = scmp.lt.s32.totalorder %s2058_s12, 1 }
  0x55   : > { %v224_v5 = vsel %vm213_vm0, %v210_v2, 0  ;;  %v212_v8 = vld [vmem:[#allocation4 + $0x8] sm:$0xff]  ;;  %v2233_v9 = vand.u32 4294901760, %v221_v3  ;;  %v2235_v10 = vand.u32 4294901760, %v215_v4  ;;  %v218_v12 = vsel %vm213_vm0, %v208_v6, 0  ;;  %s2073_s20 = smov 120  }
  0x56   : > { %v2237_v11 = vand.u32 4294901760, %v224_v5  ;;  %v2240_v13 = vand.u32 4294901760, %v218_v12  ;;  %v227_v14 = vand.u32 4294901760, %v211_v7  ;;  %v230_v15 = vand.u32 4294901760, %v212_v8  ;;  %s2374_s12 = smov (!%p198_p7, %s2058_s12), 1 }
  0x57   : > { %v314_v16 = vsub.f32 %v221_v3, %v2233_v9  ;;  %v294_v17 = vsub.f32 %v215_v4, %v2235_v10  ;;  %s1603_s16 = sshll.u32 %s2374_s12, 7  ;;  %vm814_vm1 = vcmask 64512  }
  0x58   : > { %v324_v18 = vsub.f32 %v224_v5, %v2237_v11  ;;  %846 = vrot.lane.b32.xlu1 %v210_v2, %s2072_s18  ;;  %v304_v19 = vsub.f32 %v218_v12, %v2240_v13  ;;  %842 = vrot.lane.b32.xlu0 %v208_v6, %s2072_s18  ;;  %v2246_v20 = vpack.c.bf16 %v230_v15, %v227_v14  ;;  %s2299_s4 = scalar_lea.vmem %s2353_s2, %s1603_s16 }
  0x59   : > { %v335_v21 = vsub.f32 %v211_v7, %v227_v14  ;;  %v295_v22 = vand.u32 4294901760, %v294_v17  ;;  %v315_v23 = vand.u32 4294901760, %v314_v16  ;;  %v342_v25 = vsub.f32 %v212_v8, %v230_v15 }
  0x5a   : > { %v325_v24 = vand.u32 4294901760, %v324_v18  ;;  %1797 = vmatprep.subr.bf16.mxu0 %v2246_v20  ;;  %v305_v26 = vand.u32 4294901760, %v304_v19  ;;  %1821 = vmatprep.subr.bf16.mxu1 %v2246_v20 }
  0x5b   : > { %v336_v27 = vand.u32 4294901760, %v335_v21  ;;  %1799 = vmatpush3.bf16.msra.mxu0 %v2246_v20  ;;  %v296_v28 = vsub.f32 %v294_v17, %v295_v22  ;;  %v316_v29 = vsub.f32 %v314_v16, %v315_v23  ;;  %v343_v30 = vand.u32 4294901760, %v342_v25  ;;  %1823 = vmatpush3.bf16.msra.mxu1 %v2246_v20 }
  0x5c   : > { %v306_v31 = vsub.f32 %v304_v19, %v305_v26  ;;  %v326_v32 = vsub.f32 %v324_v18, %v325_v24  ;;  %v2254_v42 = vpack.c.bf16 %v342_v25, %v335_v21 }
  0x5d   : > { %v337_v33 = vsub.f32 %v335_v21, %v336_v27  ;;  %v297_v34 = vand.u32 4294901760, %v296_v28  ;;  %v317_v35 = vand.u32 4294901760, %v316_v29  ;;  %v344_v36 = vsub.f32 %v342_v25, %v343_v30 }
  0x5e   : > { %v307_v37 = vand.u32 4294901760, %v306_v31  ;;  %v327_v40 = vand.u32 4294901760, %v326_v32  ;;  %v2266_v43 = vpack.c.bf16 %v343_v30, %v336_v27 }
  0x5f   : > { %v338_v38 = vand.u32 4294901760, %v337_v33  ;;  %1680 = vmatprep.mubr.f32.mxu0 %v297_v34  ;;  %v345_v39 = vand.u32 4294901760, %v344_v36 }
  0x60   : > { %1681 = vmatmul.mubr.f32.vlgmr.msra.gmra.mrb[0].mxu0 %v307_v37 }
  0x61   : > { %1683 = vmatprep.mubr.f32.mxu0 %v317_v35  ;;  %v2252_v41 = vpack.c.bf16 %v345_v39, %v338_v38 }
  0x63   : > { %1801 = vmatprep.subr.bf16.mxu0 %v2252_v41  ;;  %1825 = vmatprep.subr.bf16.mxu1 %v2252_v41 }
  0x64   : > { %1684 = vmatmul.mubr.f32.gmra.mrb[2].mxu0 %v327_v40 }
  0x65   : > { %1803 = vmatpush3.bf16.msra.mxu0 %v2252_v41  ;;  %1690 = vmatprep.mubr.f32.mxu0 %v2235_v10 }
  0x66   : > { %1805 = vmatprep.subr.bf16.mxu0 %v2254_v42 }
  0x68   : > { %1691 = vmatmul.mubr.f32.vlgmr.msra.gmra.mrb[0].mxu0 %v2240_v13 }
  0x69   : > { %1693 = vmatprep.mubr.f32.mxu0 %v2233_v9  ;;  %1807 = vmatpush3.bf16.msra.mxu0 %v2254_v42 }
  0x6a   : > { %1809 = vmatprep.subr.bf16.mxu0 %v2246_v20 }
  0x6c   : > { %1694 = vmatmul.mubr.f32.gmra.mrb[2].mxu0 %v2237_v11 }
  0x6d   : > { %1700 = vmatprep.mubr.f32.mxu0 %v294_v17 }
  0x70   : > { %1701 = vmatmul.mubr.f32.vlgmr.msra.gmra.mrb[0].mxu0 %v304_v19 }
  0x71   : > { %1703 = vmatprep.mubr.f32.mxu0 %v314_v16  ;;  %1811 = vmatpush3.bf16.msra.mxu0 %v2246_v20 }
  0x72   : > { %1813 = vmatprep.subr.bf16.mxu0 %v2266_v43 }
  0x74   : > { %1704 = vmatmul.mubr.f32.gmra.mrb[2].mxu0 %v324_v18 }
  0x75   : > { %1710 = vmatprep.mubr.f32.mxu0 %v295_v22 }
  0x78   : > { %1711 = vmatmul.mubr.f32.vlgmr.msra.gmra.mrb[0].mxu0 %v305_v26 }
  0x79   : > { %1713 = vmatprep.mubr.f32.mxu0 %v315_v23  ;;  %1815 = vmatpush3.bf16.msra.mxu0 %v2266_v43 }
  0x7a   : > { %1817 = vmatprep.subr.bf16.mxu0 %v2246_v20 }
  0x7c   : > { %1714 = vmatmul.mubr.f32.gmra.mrb[2].mxu0 %v325_v24 }
  0x7d   : > { %1720 = vmatprep.mubr.f32.mxu0 %v2235_v10 }
  0x80   : > { %1721 = vmatmul.mubr.f32.vlgmr.msra.gmra.mrb[0].mxu0 %v2240_v13 }
  0x81   : > { %1723 = vmatprep.mubr.f32.mxu0 %v2233_v9  ;;  %1819 = vmatpush3.bf16.msra.mxu0 %v2246_v20 }
  0x84   : > { %1724 = vmatmul.mubr.f32.gmra.mrb[2].mxu0 %v2237_v11 }
  0x85   : > { %1730 = vmatprep.mubr.f32.mxu0 %v2235_v10 }
  0x88   : > { %1731 = vmatmul.mubr.f32.vlgmr.msra.gmra.mrb[0].mxu0 %v2240_v13 }
  0x89   : > { %1733 = vmatprep.mubr.f32.mxu0 %v2233_v9 }
  0x8c   : > { %1734 = vmatmul.mubr.f32.gmra.mrb[2].mxu0 %v2237_v11 }
  0xc6   : > { %v845_v44 = vpop.permute.xlu1 %844  ;;  %v841_v45 = vpop.permute.xlu0 %840 }
  0xc7   : > { %v852_v46 = vsel %vm213_vm0, %v845_v44, 0  ;;  %v848_v47 = vsel %vm213_vm0, %v841_v45, 0 }
  0xc8   : > { %v943_v48 = vand.u32 4294901760, %v852_v46  ;;  %v923_v49 = vand.u32 4294901760, %v848_v47 }
  0xca   : > { %v944_v50 = vsub.f32 %v852_v46, %v943_v48  ;;  %v924_v51 = vsub.f32 %v848_v47, %v923_v49  ;;  %v847_v52 = vpop.permute.xlu1 %846  ;;  %v843_v53 = vpop.permute.xlu0 %842 }
  0xcb   : > { %v854_v54 = vsel %vm213_vm0, %v847_v52, 0  ;;  %v850_v55 = vsel %vm213_vm0, %v843_v53, 0 }
  0xcc   : > { %v953_v56 = vand.u32 4294901760, %v854_v54  ;;  %v933_v57 = vand.u32 4294901760, %v850_v55  ;;  %v925_v58 = vand.u32 4294901760, %v924_v51  ;;  %v945_v59 = vand.u32 4294901760, %v944_v50 }
  0xce   : > { %v954_v60 = vsub.f32 %v854_v54, %v953_v56  ;;  %v934_v61 = vsub.f32 %v850_v55, %v933_v57  ;;  %v926_v62 = vsub.f32 %v924_v51, %v925_v58  ;;  %v946_v2 = vsub.f32 %v944_v50, %v945_v59 }
  0xd0   : > { %v955_v63 = vand.u32 4294901760, %v954_v60  ;;  %v935_v0 = vand.u32 4294901760, %v934_v61  ;;  %v927_v1 = vand.u32 4294901760, %v926_v62  ;;  %v947_v6 = vand.u32 4294901760, %v946_v2 }
  0xd2   : > { %1740 = vmatprep.mubr.f32.mxu1 %v927_v1  ;;  %v936_v3 = vsub.f32 %v934_v61, %v935_v0  ;;  %v956_v5 = vsub.f32 %v954_v60, %v955_v63 }
  0xd4   : > { %v937_v4 = vand.u32 4294901760, %v936_v3  ;;  %v957_v7 = vand.u32 4294901760, %v956_v5 }
  0xd6   : > { %1741 = vmatmul.mubr.f32.vlgmr.msra.gmra.mrb[0].mxu1 %v937_v4 }
  0xd7   : > { %1827 = vmatpush3.bf16.msra.mxu1 %v2252_v41  ;;  %1743 = vmatprep.mubr.f32.mxu1 %v947_v6 }
  0xd8   : > { %1829 = vmatprep.subr.bf16.mxu1 %v2254_v42 }
  0xda   : > { %1744 = vmatmul.mubr.f32.gmra.mrb[2].mxu1 %v957_v7 }
  0xdb   : > { %1750 = vmatprep.mubr.f32.mxu1 %v923_v49 }
  0xde   : > { %1751 = vmatmul.mubr.f32.vlgmr.msra.gmra.mrb[0].mxu1 %v933_v57 }
  0xdf   : > { %1831 = vmatpush3.bf16.msra.mxu1 %v2254_v42  ;;  %1753 = vmatprep.mubr.f32.mxu1 %v943_v48 }
  0xe0   : > { %1833 = vmatprep.subr.bf16.mxu1 %v2246_v20 }
  0xe2   : > { %1754 = vmatmul.mubr.f32.gmra.mrb[2].mxu1 %v953_v56 }
  0xe3   : > { %1760 = vmatprep.mubr.f32.mxu1 %v924_v51 }
  0xe6   : > { %1761 = vmatmul.mubr.f32.vlgmr.msra.gmra.mrb[0].mxu1 %v934_v61 }
  0xe7   : > { %1835 = vmatpush3.bf16.msra.mxu1 %v2246_v20  ;;  %1763 = vmatprep.mubr.f32.mxu1 %v944_v50 }
  0xe8   : > { %1837 = vmatprep.subr.bf16.mxu1 %v2266_v43 }
  0xea   : > { %1764 = vmatmul.mubr.f32.gmra.mrb[2].mxu1 %v954_v60 }
  0xeb   : > { %1770 = vmatprep.mubr.f32.mxu1 %v925_v58 }
  0xee   : > { %1771 = vmatmul.mubr.f32.vlgmr.msra.gmra.mrb[0].mxu1 %v935_v0 }
  0xef   : > { %1839 = vmatpush3.bf16.msra.mxu1 %v2266_v43  ;;  %1773 = vmatprep.mubr.f32.mxu1 %v945_v59 }
  0xf0   : > { %1841 = vmatprep.subr.bf16.mxu1 %v2246_v20 }
  0xf2   : > { %1774 = vmatmul.mubr.f32.gmra.mrb[2].mxu1 %v955_v63 }
  0xf3   : > { %1780 = vmatprep.mubr.f32.mxu1 %v923_v49 }
  0xf6   : > { %1781 = vmatmul.mubr.f32.vlgmr.msra.gmra.mrb[0].mxu1 %v933_v57 }
  0xf7   : > { %1843 = vmatpush3.bf16.msra.mxu1 %v2246_v20  ;;  %1783 = vmatprep.mubr.f32.mxu1 %v943_v48 }
  0xfa   : > { %1784 = vmatmul.mubr.f32.gmra.mrb[2].mxu1 %v953_v56 }
  0xfb   : > { %1790 = vmatprep.mubr.f32.mxu1 %v923_v49 }
  0xfe   : > { %1791 = vmatmul.mubr.f32.vlgmr.msra.gmra.mrb[0].mxu1 %v933_v57 }
  0xff   : > { %1793 = vmatprep.mubr.f32.mxu1 %v943_v48 }
 0x102   : > { %1794 = vmatmul.mubr.f32.gmra.mrb[2].mxu1 %v953_v56 }
 0x15b   : > { %v1732_v8 = vpop.f32.mrb[0].mxu0 }
 0x15c   : > { %816 = vst.msk [vmem:[%s2299_s4 + $0x8] sm:$0xff] %vm814_vm1, %v1732_v8  ;;  %v792_v9 = vpop.f32.mrb[1].mxu0  ;;  %825 = vrot.lane.b32.xlu1 %v1732_v8, %s2073_s20 }
 0x15d   : > { %815 = vst.msk [vmem:[%s2299_s4] sm:$0xff] %vm814_vm1, %v792_v9  ;;  %823 = vrot.lane.b32.xlu0 %v792_v9, %s2073_s20 }
 0x15f   : > { %v1735_v10 = vpop.f32.mrb[2].mxu0 }
 0x160   : > { %818 = vst.msk [vmem:[%s2299_s4 + $0x18] sm:$0xff] %vm814_vm1, %v1735_v10  ;;  %v804_v11 = vpop.f32.mrb[3].mxu0  ;;  %829 = vrot.lane.b32.xlu1 %v1735_v10, %s2073_s20 }
 0x161   : > { %817 = vst.msk [vmem:[%s2299_s4 + $0x10] sm:$0xff] %vm814_vm1, %v804_v11  ;;  %827 = vrot.lane.b32.xlu0 %v804_v11, %s2073_s20 }
 0x1ce   : > { %v826_v12 = vpop.permute.xlu1 %825 }
 0x1cf   : > { %1589 = vst.msk [vmem:[%s2299_s4 + $0x28] sm:$0xff] %vm814_vm1, %v826_v12  ;;  %v824_v13 = vpop.permute.xlu0 %823 }
 0x1d0   : > { %1588 = vst.msk [vmem:[%s2299_s4 + $0x20] sm:$0xff] %vm814_vm1, %v824_v13 }
 0x1d1   : > { %v1792_v14 = vpop.f32.mrb[0].mxu1 }
 0x1d2   : > { %1593 = vst.msk [vmem:[%s2299_s4 + $0x48] sm:$0xff] %vm814_vm1, %v1792_v14  ;;  %v1422_v15 = vpop.f32.mrb[1].mxu1  ;;  %1455 = vrot.lane.b32.xlu1 %v1792_v14, %s2073_s20  ;;  %v830_v16 = vpop.permute.xlu1 %829 }
 0x1d3   : > { %1592 = vst.msk [vmem:[%s2299_s4 + $0x40] sm:$0xff] %vm814_vm1, %v1422_v15  ;;  %1453 = vrot.lane.b32.xlu0 %v1422_v15, %s2073_s20  ;;  %1591 = vst.msk [vmem:[%s2299_s4 + $0x38] sm:$0xff] %vm814_vm1, %v830_v16  ;;  %v828_v17 = vpop.permute.xlu0 %827 }
 0x1d4   : > { %1590 = vst.msk [vmem:[%s2299_s4 + $0x30] sm:$0xff] %vm814_vm1, %v828_v17 }
 0x1d5   : > { %v1795_v18 = vpop.f32.mrb[2].mxu1 }
 0x1d6   : > { %1595 = vst.msk [vmem:[%s2299_s4 + $0x58] sm:$0xff] %vm814_vm1, %v1795_v18  ;;  %v1434_v19 = vpop.f32.mrb[3].mxu1  ;;  %1459 = vrot.lane.b32.xlu1 %v1795_v18, %s2073_s20 }
 0x1d7   : > { %1594 = vst.msk [vmem:[%s2299_s4 + $0x50] sm:$0xff] %vm814_vm1, %v1434_v19  ;;  %1457 = vrot.lane.b32.xlu0 %v1434_v19, %s2073_s20 }
 0x244   : > { %v1456_v20 = vpop.permute.xlu1 %1455 }
 0x245   : > { %1597 = vst.msk [vmem:[%s2299_s4 + $0x68] sm:$0xff] %vm814_vm1, %v1456_v20  ;;  %v1454_v21 = vpop.permute.xlu0 %1453 }
 0x246   : > { %1596 = vst.msk [vmem:[%s2299_s4 + $0x60] sm:$0xff] %vm814_vm1, %v1454_v21 }
 0x248   : > { %v1460_v22 = vpop.permute.xlu1 %1459 }
 0x249   : > { %1599 = vst.msk [vmem:[%s2299_s4 + $0x78] sm:$0xff] %vm814_vm1, %v1460_v22  ;;  %v1458_v23 = vpop.permute.xlu0 %1457 }
 0x24a   : > { %1598 = vst.msk [vmem:[%s2299_s4 + $0x70] sm:$0xff] %vm814_vm1, %v1458_v23 }
 0x24b PF: > { %s16_s14 = sadd.s32 1, %s2066_s14   ;;  %s2366_s9 = smov %s2050_s10 }
 0x24c   : > { %p13_p1 = scmp.ge.s32.totalorder %s16_s14, 4   ;;  %s2367_s10 = smov %s2054_s11 }
 0x24d   : > { %s2368_s11 = smov %s2175_s21  ;;  %s2369_s12 = smov %s2062_s13 }
 0x24e   : > { %s2370_s13 = smov %s2372_s22  ;;  %15 = sbr.rel (!%p13_p1) target bundleno = 5 (0x5), region = 75 }
 0x255   :  { %1500 = vsyncpa [#allocation3], 1 }
 0x256   :  { %1502 = vsyncpa [#allocation3 + $0x1], 1 }
 0x257   :  { %1503 = vsyncpa [#allocation5], 1 }

</bundles_post_ra>
